<compile_context>
chip_gen: v7x
topology: tpu7x:2x2x1
jax: 0.10.0
libtpu: 0.0.40
codegen_flags: <defaults>
</compile_context>

<pallas_src>
import functools

import jax
import jax.numpy as jnp
from jax.experimental import pallas as pl
from jax.experimental.pallas import tpu as pltpu


def _label_smoothing_kernel(pred_ref, tgt_ref, loss_ref, *,
                            classes, smoothing, confidence,
                            true_b, tile_b, needs_mask):
    # pred_ref: (TB, C) native dtype in VMEM
    # tgt_ref : (TB, 1) int32      in VMEM
    # loss_ref: (TB, 1) float32    in VMEM (per-row loss)
    pred_nat = pred_ref[...]                         # native dtype (TB, C)
    tgt = tgt_ref[...]                               # (TB, 1) int32
    tb, c = pred_nat.shape

    # Target-class logit extracted on the native tile (exact: selects exactly
    # one element per row, so the reduce is lossless even in bf16).
    col = jax.lax.broadcasted_iota(jnp.int32, (tb, c), 1)
    onehot = col == tgt                              # (TB, C)
    tgt_val = jnp.sum(
        jnp.where(onehot, pred_nat, jnp.zeros_like(pred_nat)),
        axis=-1, keepdims=True).astype(jnp.float32)  # (TB, 1)

    pred = pred_nat.astype(jnp.float32)              # f32 for the softmax math
    m = jnp.max(pred, axis=-1, keepdims=True)                    # (TB, 1)
    shifted = pred - m                                            # (TB, C)
    lse = jnp.log(jnp.sum(jnp.exp(shifted), axis=-1, keepdims=True))  # (TB, 1)

    # sum_k logp[k] = sum_k shifted[k] - C * lse   (no (TB, C) logp tensor)
    sum_logp = jnp.sum(shifted, axis=-1, keepdims=True) - c * lse     # (TB, 1)
    tgt_logp = (tgt_val - m) - lse                                    # (TB, 1)

    smooth_val = smoothing / (classes - 1)
    per_row = -((confidence - smooth_val) * tgt_logp + smooth_val * sum_logp)

    if needs_mask:
        # Only the cheap (TB, 1) mask is needed: select semantics keep any
        # NaN/Inf from padded garbage rows out of the written values, and
        # out-of-bounds rows of the last block are dropped by Pallas anyway.
        i = pl.program_id(0)
        row = jax.lax.broadcasted_iota(jnp.int32, (tb, 1), 0)
        valid = (i * tile_b + row) < true_b
        per_row = jnp.where(valid, per_row, 0.0)

    loss_ref[...] = per_row


def _sublane_multiple(dtype):
    """Sublane packing for the dtype: 8 for 32-bit, 16 for 16-bit, 32 for 8-bit."""
    bits = jnp.dtype(dtype).itemsize * 8
    if bits >= 32:
        return 8
    if bits == 16:
        return 16
    return 32


def _pick_tile_b(batch, num_classes, dtype, vmem_budget_bytes=40 << 20):
    """Pick a batch tile purely from a VMEM byte budget.

    Per grid step we account for 2x double-buffered native-dtype input tiles
    plus ~4 f32 (TB, C) temporaries (cast pred, shifted, exp, onehot select).
    """
    itemsize = jnp.dtype(dtype).itemsize
    mult = _sublane_multiple(dtype)
    bytes_per_row = num_classes * (2 * itemsize + 4 * 4) + 64
    rows = max(mult, vmem_budget_bytes // max(1, bytes_per_row))
    rows = min(rows, batch)
    if rows < batch:
        rows = max(mult, (rows // mult) * mult)
    return int(rows)


def label_smoothing_loss(pred, target, *, classes, smoothing=0.1, tile_b=None):
    """pred: (B, C) float (any dtype), target: (B,) int class indices."""
    assert pred.ndim == 2 and pred.shape[1] == classes
    b, c = pred.shape
    confidence = 1.0 - smoothing

    mult = _sublane_multiple(pred.dtype)
    if tile_b is None:
        tile_b = _pick_tile_b(b, c, pred.dtype)
    else:
        tile_b = min(int(tile_b), b)
        if tile_b < b:
            tile_b = max(mult, (tile_b // mult) * mult)

    num_tiles = pl.cdiv(b, tile_b)
    needs_mask = (b % tile_b) != 0

    tgt2d = target.astype(jnp.int32).reshape(b, 1)

    kernel = functools.partial(
        _label_smoothing_kernel,
        classes=classes,
        smoothing=float(smoothing),
        confidence=float(confidence),
        true_b=b,
        tile_b=tile_b,
        needs_mask=needs_mask,
    )

    itemsize = pred.dtype.itemsize
    cost = pl.CostEstimate(
        flops=6 * b * c,
        transcendentals=b * c + b,
        bytes_accessed=b * c * itemsize + b * 4 + b * 4,
    )

    # Generation-aware-ish VMEM limit: big enough to hold the chosen tiles
    # (above v5e's 16 MiB / v6e-v7x's 32 MiB scoped defaults), but capped at
    # 48 MiB so it always fits v7x's 64 MiB physical VMEM.
    est_bytes = tile_b * c * (2 * itemsize + 4 * 4) + tile_b * 64
    vmem_limit = int(min(48 << 20, max(est_bytes + (2 << 20), 8 << 20)))

    per_row = pl.pallas_call(
        kernel,
        out_shape=jax.ShapeDtypeStruct((b, 1), jnp.float32),
        grid=(num_tiles,),
        in_specs=[
            pl.BlockSpec((tile_b, c), lambda i: (i, 0)),   # pred, native dtype
            pl.BlockSpec((tile_b, 1), lambda i: (i, 0)),   # target indices
        ],
        out_specs=pl.BlockSpec((tile_b, 1), lambda i: (i, 0)),  # per-row loss
        compiler_params=pltpu.CompilerParams(
            dimension_semantics=("parallel",),   # independent tiles -> dual-TC on v7x
            vmem_limit_bytes=vmem_limit,
        ),
        cost_estimate=cost,
    )(pred, tgt2d)

    # Final mean in the wrapper (tiny XLA reduction, pairwise summation).
    return jnp.sum(per_row) / b


if __name__ == "__main__":
    key = jax.random.PRNGKey(0)

    def ref_loss(pred, target, classes, smoothing):
        logp = jax.nn.log_softmax(pred.astype(jnp.float32), axis=-1)
        bsz = pred.shape[0]
        true_dist = jnp.full((bsz, classes), smoothing / (classes - 1), jnp.float32)
        true_dist = true_dist.at[jnp.arange(bsz), target].set(1.0 - smoothing)
        return jnp.mean(jnp.sum(-true_dist * logp, axis=-1))

    # Case 1: f32 logits, forced small tile -> multi-step pipelined grid.
    B1, C1 = 16, 128
    kp, kt = jax.random.split(key)
    pred1 = jax.random.normal(kp, (B1, C1), dtype=jnp.float32)
    tgt1 = jax.random.randint(kt, (B1,), 0, C1, dtype=jnp.int32)
    loss1 = label_smoothing_loss(pred1, tgt1, classes=C1, smoothing=0.1, tile_b=8)
    jax.block_until_ready(loss1)
    ref1 = ref_loss(pred1, tgt1, C1, 0.1)
    assert jnp.allclose(loss1, ref1, atol=1e-4, rtol=1e-4), (loss1, ref1)

    # Case 2: bf16 logits (native dtype through HBM), tile rounded to the
    # bf16 sublane packing of 16, ragged final tile -> per-row mask path.
    B2, C2 = 24, 128
    kp2, kt2 = jax.random.split(kt)
    pred2 = jax.random.normal(kp2, (B2, C2), dtype=jnp.bfloat16)
    tgt2 = jax.random.randint(kt2, (B2,), 0, C2, dtype=jnp.int32)
    loss2 = label_smoothing_loss(pred2, tgt2, classes=C2, smoothing=0.1, tile_b=16)
    jax.block_until_ready(loss2)
    ref2 = ref_loss(pred2, tgt2, C2, 0.1)
    assert jnp.allclose(loss2, ref2, atol=1e-3, rtol=1e-3), (loss2, ref2)

    # Case 3: auto tile sizing (whole batch fits one tile), odd batch size.
    B3, C3 = 12, 256
    kp3, kt3 = jax.random.split(kt2)
    pred3 = jax.random.normal(kp3, (B3, C3), dtype=jnp.float32)
    tgt3 = jax.random.randint(kt3, (B3,), 0, C3, dtype=jnp.int32)
    loss3 = label_smoothing_loss(pred3, tgt3, classes=C3, smoothing=0.2)
    jax.block_until_ready(loss3)
    ref3 = ref_loss(pred3, tgt3, C3, 0.2)
    assert jnp.allclose(loss3, ref3, atol=1e-4, rtol=1e-4), (loss3, ref3)

    print("KERNEL_OK")
</pallas_src>

<mosaic_0001>
module attributes {stable_mosaic.version = 11 : i64} {
  func.func @_label_smoothing_kernel(%arg0: i32, %arg1: memref<8x128xf32, #tpu.memory_space<vmem>>, %arg2: memref<8x1xi32, #tpu.memory_space<vmem>>, %arg3: memref<8x1xf32, #tpu.memory_space<vmem>>) attributes {dimension_semantics = [#tpu.dimension_semantics<parallel>], iteration_bounds = array<i64: 2>, scalar_prefetch = 0 : i64, scratch_operands = 0 : i64, tpu.core_type = #tpu.core_type<tc>, window_params = [{transform_indices = @transform_0, window_bounds = array<i64: 8, 128>}, {transform_indices = @transform_1, window_bounds = array<i64: 8, 1>}, {transform_indices = @transform_2, window_bounds = array<i64: 8, 1>}]} {
    %c0 = arith.constant 0 : index
    %c0_0 = arith.constant 0 : index
    %0 = vector.load %arg1[%c0, %c0_0] : memref<8x128xf32, #tpu.memory_space<vmem>>, vector<8x128xf32>
    %c0_1 = arith.constant 0 : index
    %c0_2 = arith.constant 0 : index
    %1 = vector.load %arg2[%c0_1, %c0_2] : memref<8x1xi32, #tpu.memory_space<vmem>>, vector<8x1xi32>
    %2 = tpu.iota {dimensions = array<i32: 1>} : vector<8x128xi32>
    %3 = vector.broadcast %1 : vector<8x1xi32> to vector<8x128xi32>
    %4 = arith.cmpi eq, %2, %3 : vector<8x128xi32>
    %cst = arith.constant 0.000000e+00 : f32
    %5 = vector.broadcast %cst : f32 to vector<8x128xf32>
    %6 = arith.select %4, %0, %5 : vector<8x128xi1>, vector<8x128xf32>
    %cst_3 = arith.constant dense<0.000000e+00> : vector<8xf32>
    %7 = vector.multi_reduction <add>, %6, %cst_3 [1] : vector<8x128xf32> to vector<8xf32>
    %8 = vector.shape_cast %7 : vector<8xf32> to vector<8x1xf32>
    %cst_4 = arith.constant dense<0xFF800000> : vector<8xf32>
    %9 = vector.multi_reduction <maximumf>, %0, %cst_4 [1] : vector<8x128xf32> to vector<8xf32>
    %10 = vector.shape_cast %9 : vector<8xf32> to vector<8x1xf32>
    %11 = vector.broadcast %10 : vector<8x1xf32> to vector<8x128xf32>
    %12 = arith.subf %0, %11 : vector<8x128xf32>
    %13 = math.exp %12 : vector<8x128xf32>
    %cst_5 = arith.constant dense<0.000000e+00> : vector<8xf32>
    %14 = vector.multi_reduction <add>, %13, %cst_5 [1] : vector<8x128xf32> to vector<8xf32>
    %15 = vector.shape_cast %14 : vector<8xf32> to vector<8x1xf32>
    %16 = math.log %15 : vector<8x1xf32>
    %cst_6 = arith.constant dense<0.000000e+00> : vector<8xf32>
    %17 = vector.multi_reduction <add>, %12, %cst_6 [1] : vector<8x128xf32> to vector<8xf32>
    %18 = vector.shape_cast %17 : vector<8xf32> to vector<8x1xf32>
    %cst_7 = arith.constant 1.280000e+02 : f32
    %19 = vector.broadcast %cst_7 : f32 to vector<8x1xf32>
    %20 = arith.mulf %19, %16 : vector<8x1xf32>
    %21 = arith.subf %18, %20 : vector<8x1xf32>
    %22 = arith.subf %8, %10 : vector<8x1xf32>
    %23 = arith.subf %22, %16 : vector<8x1xf32>
    %cst_8 = arith.constant 0.899212599 : f32
    %24 = vector.broadcast %cst_8 : f32 to vector<8x1xf32>
    %25 = arith.mulf %24, %23 : vector<8x1xf32>
    %cst_9 = arith.constant 7.87401571E-4 : f32
    %26 = vector.broadcast %cst_9 : f32 to vector<8x1xf32>
    %27 = arith.mulf %26, %21 : vector<8x1xf32>
    %28 = arith.addf %25, %27 : vector<8x1xf32>
    %cst_10 = arith.constant 0.000000e+00 : f32
    %29 = vector.broadcast %cst_10 : f32 to vector<8x1xf32>
    %30 = arith.subf %29, %28 : vector<8x1xf32>
    %c0_11 = arith.constant 0 : index
    %c0_12 = arith.constant 0 : index
    %31 = vector.load %arg3[%c0_11, %c0_12] : memref<8x1xf32, #tpu.memory_space<vmem>>, vector<8x1xf32>
    tpu.vector_store %arg3[%c0_11, %c0_12], %30 {strides = array<i32>} : memref<8x1xf32, #tpu.memory_space<vmem>>, vector<8x1xf32>,
    return
  }
  func.func @transform_0(%arg0: i32) -> (i32, i32) {
    %c0_i32 = arith.constant 0 : i32
    %c0_i32_0 = arith.constant 0 : i32
    return %arg0, %c0_i32 : i32, i32
  }
  func.func @transform_1(%arg0: i32) -> (i32, i32) {
    %c0_i32 = arith.constant 0 : i32
    %c0_i32_0 = arith.constant 0 : i32
    return %arg0, %c0_i32 : i32, i32
  }
  func.func @transform_2(%arg0: i32) -> (i32, i32) {
    %c0_i32 = arith.constant 0 : i32
    %c0_i32_0 = arith.constant 0 : i32
    return %arg0, %c0_i32 : i32, i32
  }
}

</mosaic_0001>

<bundles_post_ra>
// kernel: tpu_custom_call.1
= control target key start
LH: loop header
LB: loop body
LE: loop exit
PB: predicated region body
PF: predicated region fallthrough
CT: control target
= control target key end

     0   :  { %s301_s9 = smov 0   ;;  %s326_s0 = inlined_call_operand.vmem [shape: f32[16,128], index: 0, kind: input, shape index: {}]   ;;  %s327_s1 = inlined_call_operand.vmem [shape: s32[16,1], index: 1, kind: input, shape index: {}]   ;;  %s328_s2 = inlined_call_operand.vmem [shape: f32[16,1], index: 2, kind: output, shape index: {}]  }
   0x1 LB: > { %s253_s10 = sadd.s32 4294967295, %s283_s9   ;;  %p257_p0 = scmp.ge.s32.totalorder %s283_s9, 1  ;;  %s283_s9 = sphi %s301_s9, %s12_s9  }
   0x2   : > { %p120_p1 = scmp.lt.s32.totalorder %s283_s9, 3 }
   0x4   : > { %p121_p2 = pnand %p257_p0, %p120_p1 }
   0x5   : > { %p144_p3 = scmp.lt.s32.totalorder (!%p121_p2), %s253_s10, 1  ;;  %v285_v0 = vmov (!%p121_p2), 0   ;;  %v158_v6 = vlaneseq (!%p121_p2)  ;;  %vm186_vm1 = vcmask (!%p121_p2), 7168  }
   0x6   : > { %124 = sbr.rel (%p121_p2) target bundleno = 340 (0x154), region = 28  ;;  %272 = vset.pattern.permute.xlu0 (!%p121_p2), %v285_v0 }
   0x7   : > { %v159_v7 = vand.u32 (!%p121_p2), 127, %v158_v6 }
   0xd   : > { %s330_s10 = smov (!%p144_p3, %s253_s10), 1 }
   0xe   : > { %s309_s11 = sshll.u32 %s330_s10, 3 }
   0xf   : > { %s147_s14 = scalar_lea.vmem %s326_s0, %s309_s11  ;;  %s151_s17 = scalar_lea.vmem %s327_s1, %s309_s11 }
  0x10   : > { %v156_v1 = vld [vmem:[%s147_s14] sm:$0xff]  ;;  %s155_s20 = scalar_lea.vmem %s328_s2, %s309_s11 }
  0x11   : > { %167 = vmax.xlane.f32.xlu0 %v156_v1  ;;  %v157_v2 = vld [vmem:[%s151_s17] sm:$0xff] }
  0x27   : > { %161 = vperm.xlu0 %272, %v157_v2  }
  0x9e   : > { %v168_v3 = vpop.xlane.xlu0 %167 }
  0x9f   : > { %v169_v4 = vsub.f32 %v156_v1, %v168_v3 }
  0xa1   : > { %v170_v5 = vmul.f32 1.442695, %v169_v4 }
  0xa3   : > { %273 = vpow2.f32 %v170_v5 }
  0xa6   : > { %v162_v8 = vpop.permute.xlu0 %161 }
  0xa7   : > { %vm163_vm0 = vcmp.eq.s32.totalorder %v159_v7, %v162_v8 }
  0xa8   : > { %v164_v10 = vsel %vm163_vm0, %v156_v1, 0.0 }
  0xad   : > { %v274_v9 = vpop.eup %273 }
  0xae   : > { %172 = vadd.xlane.f32.xlu1 %v274_v9 }
  0xb2   : > { %165 = vadd.xlane.f32.xlu1 %v164_v10 }
  0xb6   : > { %176 = vadd.xlane.f32.xlu1 %v169_v4 }
 0x13b   : > { %v173_v11 = vpop.xlane.xlu1 %172 }
 0x13c   : > { %275 = vlog2.f32 %v173_v11 }
 0x13f   : > { %v166_v12 = vpop.xlane.xlu1 %165 }
 0x140   : > { %v180_v15 = vsub.f32 %v166_v12, %v168_v3 }
 0x143   : > { %v177_v18 = vpop.xlane.xlu1 %176 }
 0x146   : > { %v276_v13 = vpop.eup %275 }
 0x147   : > { %v175_v14 = vmul.f32 0.6931472, %v276_v13 }
 0x149   : > { %v181_v16 = vsub.f32 %v180_v15, %v175_v14  ;;  %v178_v17 = vmul.f32 128.0, %v175_v14 }
 0x14b   : > { %v179_v19 = vsub.f32 %v177_v18, %v178_v17  ;;  %v182_v20 = vmul.f32 0.8992126, %v181_v16 }
 0x14d   : > { %v183_v21 = vmul.f32 0.0007874016, %v179_v19 }
 0x14f   : > { %v184_v22 = vadd.f32 %v183_v21, %v182_v20 }
 0x151   : > { %v185_v23 = vsub.f32 0.0, %v184_v22 }
 0x153   : > { %187 = vst.msk [vmem:[%s155_s20] sm:$0xff] %vm186_vm1, %v185_v23 }
 0x154 PF: > { %s12_s9 = sadd.s32 1, %s283_s9  }
 0x155   : > { %p9_p4 = scmp.ge.s32.totalorder %s12_s9, 4  }
 0x157   :  { %11 = sbr.rel (!%p9_p4) target bundleno = 1 (0x1), region = 61 }

</bundles_post_ra>
